<compile_context>
chip_gen: v6e
topology: v6e:2x2x1
jax: 0.10.0
libtpu: 0.0.40
codegen_flags: <defaults>
</compile_context>

<pallas_src>
import jax
import jax.numpy as jnp
from jax.experimental import pallas as pl
from jax.experimental.pallas import tpu as pltpu

IN_F, H1, H2, OUT_F = 10, 128, 64, 2


def mlp_kernel(x_ref, w1_ref, b1_ref, w2_ref, b2_ref, w3_ref, b3_ref, o_ref):
    # Feature-major: features on sublanes, batch on lanes.
    x = x_ref[...]                                                      # (10,  TB)
    h1 = jnp.dot(w1_ref[...], x, preferred_element_type=jnp.float32)    # (128, TB)
    h1 = jnp.maximum(h1 + b1_ref[...], 0.0)
    h2 = jnp.dot(w2_ref[...], h1, preferred_element_type=jnp.float32)   # (64,  TB)
    h2 = jnp.maximum(h2 + b2_ref[...], 0.0)
    out = jnp.dot(w3_ref[...], h2, preferred_element_type=jnp.float32)  # (2,   TB)
    o_ref[...] = (out + b3_ref[...]).astype(o_ref.dtype)


def simple_model_forward(x, params, *, tb=512):
    """x: (B, 10) float32 (same layout as the PyTorch module). Returns (B, 2)."""
    w1, b1, w2, b2, w3, b3 = (params["w1"], params["b1"], params["w2"],
                              params["b2"], params["w3"], params["b3"])
    B = x.shape[0]
    # Batch tile must be a multiple of 128 lanes; don't over-pad tiny batches.
    tb = min(tb, pl.cdiv(B, 128) * 128)
    b_pad = pl.cdiv(B, tb) * tb
    num_tiles = b_pad // tb

    # Layout plumbing outside the kernel: pad batch to a tile multiple, then
    # transpose to feature-major (10, B_pad) so batch sits on the lane dim.
    x_fm = jnp.pad(x, ((0, b_pad - B), (0, 0))).T                       # (10, B_pad)

    flops = 2 * b_pad * (IN_F * H1 + H1 * H2 + H2 * OUT_F)
    bytes_accessed = 4 * (b_pad * (IN_F + OUT_F)
                          + H1 * IN_F + H1 + H2 * H1 + H2 + OUT_F * H2 + OUT_F)

    def weight_spec(shape):
        # Same block index every grid step -> weights stay resident in VMEM.
        return pl.BlockSpec(shape, lambda i: (0, 0))

    out_fm = pl.pallas_call(
        mlp_kernel,
        out_shape=jax.ShapeDtypeStruct((OUT_F, b_pad), jnp.float32),
        grid=(num_tiles,),
        in_specs=[
            pl.BlockSpec((IN_F, tb), lambda i: (0, i)),   # x batch tile
            weight_spec((H1, IN_F)), weight_spec((H1, 1)),
            weight_spec((H2, H1)),   weight_spec((H2, 1)),
            weight_spec((OUT_F, H2)), weight_spec((OUT_F, 1)),
        ],
        out_specs=pl.BlockSpec((OUT_F, tb), lambda i: (0, i)),
        compiler_params=pltpu.CompilerParams(
            dimension_semantics=("parallel",)),
        cost_estimate=pl.CostEstimate(
            flops=flops, transcendentals=0, bytes_accessed=bytes_accessed),
    )(x_fm, w1, b1, w2, b2, w3, b3)

    return out_fm.T[:B]                                                 # (B, 2)


def init_params(key):
    """Deterministic synthetic init; PyTorch-native (out, in) weight layout."""
    k1, k2, k3, k4, k5, k6 = jax.random.split(key, 6)

    def unif(k, shape, fan_in):
        bound = 1.0 / jnp.sqrt(float(fan_in))
        return jax.random.uniform(k, shape, jnp.float32, -bound, bound)

    return {
        "w1": unif(k1, (H1, IN_F), IN_F),  "b1": unif(k2, (H1, 1), IN_F),
        "w2": unif(k3, (H2, H1), H1),      "b2": unif(k4, (H2, 1), H1),
        "w3": unif(k5, (OUT_F, H2), H2),   "b3": unif(k6, (OUT_F, 1), H2),
    }


def reference_forward(x, params):
    h1 = jnp.maximum(x @ params["w1"].T + params["b1"].reshape(1, -1), 0.0)
    h2 = jnp.maximum(h1 @ params["w2"].T + params["b2"].reshape(1, -1), 0.0)
    return h2 @ params["w3"].T + params["b3"].reshape(1, -1)


if __name__ == "__main__":
    key = jax.random.PRNGKey(0)
    kx, kp = jax.random.split(key)
    # B=300 with tb=128 exercises both the batch padding path (300 -> 384)
    # and a multi-step grid (3 tiles) with VMEM-resident weights.
    B = 300
    x = jax.random.normal(kx, (B, IN_F), jnp.float32)
    params = init_params(kp)

    out = simple_model_forward(x, params, tb=128)
    out = jax.block_until_ready(out)

    ref = reference_forward(x, params)
    assert out.shape == (B, OUT_F), out.shape
    assert jnp.allclose(out, ref, atol=1e-5, rtol=1e-5), "mismatch vs reference"
    print("KERNEL_OK")
</pallas_src>

<mosaic_0001>
module attributes {stable_mosaic.version = 11 : i64} {
  func.func @mlp_kernel(%arg0: i32, %arg1: memref<10x128xf32, #tpu.memory_space<vmem>>, %arg2: memref<128x10xf32, #tpu.memory_space<vmem>>, %arg3: memref<128x1xf32, #tpu.memory_space<vmem>>, %arg4: memref<64x128xf32, #tpu.memory_space<vmem>>, %arg5: memref<64x1xf32, #tpu.memory_space<vmem>>, %arg6: memref<2x64xf32, #tpu.memory_space<vmem>>, %arg7: memref<2x1xf32, #tpu.memory_space<vmem>>, %arg8: memref<2x128xf32, #tpu.memory_space<vmem>>) attributes {dimension_semantics = [#tpu.dimension_semantics<parallel>], iteration_bounds = array<i64: 3>, scalar_prefetch = 0 : i64, scratch_operands = 0 : i64, tpu.core_type = #tpu.core_type<tc>, window_params = [{transform_indices = @transform_0, window_bounds = array<i64: 10, 128>}, {pipeline_mode = #tpu.pipeline_mode<synchronous>, transform_indices = @transform_1, window_bounds = array<i64: 128, 10>}, {pipeline_mode = #tpu.pipeline_mode<synchronous>, transform_indices = @transform_2, window_bounds = array<i64: 128, 1>}, {pipeline_mode = #tpu.pipeline_mode<synchronous>, transform_indices = @transform_3, window_bounds = array<i64: 64, 128>}, {pipeline_mode = #tpu.pipeline_mode<synchronous>, transform_indices = @transform_4, window_bounds = array<i64: 64, 1>}, {pipeline_mode = #tpu.pipeline_mode<synchronous>, transform_indices = @transform_5, window_bounds = array<i64: 2, 64>}, {pipeline_mode = #tpu.pipeline_mode<synchronous>, transform_indices = @transform_6, window_bounds = array<i64: 2, 1>}, {transform_indices = @transform_7, window_bounds = array<i64: 2, 128>}]} {
    %c0 = arith.constant 0 : index
    %c0_0 = arith.constant 0 : index
    %0 = vector.load %arg1[%c0, %c0_0] : memref<10x128xf32, #tpu.memory_space<vmem>>, vector<10x128xf32>
    %c0_1 = arith.constant 0 : index
    %c0_2 = arith.constant 0 : index
    %1 = vector.load %arg2[%c0_1, %c0_2] : memref<128x10xf32, #tpu.memory_space<vmem>>, vector<128x10xf32>
    %cst = arith.constant dense<0.000000e+00> : vector<128x128xf32>
    %2 = tpu.matmul %1, %0, %cst {dimension_numbers = #tpu.dot_dimension_numbers<[1], [0], [0], [1], [0, 0, 1, 1], [], []>} : vector<128x10xf32>, vector<10x128xf32>, vector<128x128xf32> -> vector<128x128xf32>
    %c0_3 = arith.constant 0 : index
    %c0_4 = arith.constant 0 : index
    %3 = vector.load %arg3[%c0_3, %c0_4] : memref<128x1xf32, #tpu.memory_space<vmem>>, vector<128x1xf32>
    %4 = vector.broadcast %3 : vector<128x1xf32> to vector<128x128xf32>
    %5 = arith.addf %2, %4 : vector<128x128xf32>
    %cst_5 = arith.constant 0.000000e+00 : f32
    %6 = vector.broadcast %cst_5 : f32 to vector<128x128xf32>
    %7 = arith.maximumf %5, %6 : vector<128x128xf32>
    %c0_6 = arith.constant 0 : index
    %c0_7 = arith.constant 0 : index
    %8 = vector.load %arg4[%c0_6, %c0_7] : memref<64x128xf32, #tpu.memory_space<vmem>>, vector<64x128xf32>
    %cst_8 = arith.constant dense<0.000000e+00> : vector<64x128xf32>
    %9 = tpu.matmul %8, %7, %cst_8 {dimension_numbers = #tpu.dot_dimension_numbers<[1], [0], [0], [1], [0, 0, 1, 1], [], []>} : vector<64x128xf32>, vector<128x128xf32>, vector<64x128xf32> -> vector<64x128xf32>
    %c0_9 = arith.constant 0 : index
    %c0_10 = arith.constant 0 : index
    %10 = vector.load %arg5[%c0_9, %c0_10] : memref<64x1xf32, #tpu.memory_space<vmem>>, vector<64x1xf32>
    %11 = vector.broadcast %10 : vector<64x1xf32> to vector<64x128xf32>
    %12 = arith.addf %9, %11 : vector<64x128xf32>
    %cst_11 = arith.constant 0.000000e+00 : f32
    %13 = vector.broadcast %cst_11 : f32 to vector<64x128xf32>
    %14 = arith.maximumf %12, %13 : vector<64x128xf32>
    %c0_12 = arith.constant 0 : index
    %c0_13 = arith.constant 0 : index
    %15 = vector.load %arg6[%c0_12, %c0_13] : memref<2x64xf32, #tpu.memory_space<vmem>>, vector<2x64xf32>
    %cst_14 = arith.constant dense<0.000000e+00> : vector<2x128xf32>
    %16 = tpu.matmul %15, %14, %cst_14 {dimension_numbers = #tpu.dot_dimension_numbers<[1], [0], [0], [1], [0, 0, 1, 1], [], []>} : vector<2x64xf32>, vector<64x128xf32>, vector<2x128xf32> -> vector<2x128xf32>
    %c0_15 = arith.constant 0 : index
    %c0_16 = arith.constant 0 : index
    %17 = vector.load %arg7[%c0_15, %c0_16] : memref<2x1xf32, #tpu.memory_space<vmem>>, vector<2x1xf32>
    %18 = vector.broadcast %17 : vector<2x1xf32> to vector<2x128xf32>
    %19 = arith.addf %16, %18 : vector<2x128xf32>
    %c0_17 = arith.constant 0 : index
    %c0_18 = arith.constant 0 : index
    %20 = vector.load %arg8[%c0_17, %c0_18] : memref<2x128xf32, #tpu.memory_space<vmem>>, vector<2x128xf32>
    tpu.vector_store %arg8[%c0_17, %c0_18], %19 {strides = array<i32>} : memref<2x128xf32, #tpu.memory_space<vmem>>, vector<2x128xf32>,
    return
  }
  func.func @transform_0(%arg0: i32) -> (i32, i32) {
    %c0_i32 = arith.constant 0 : i32
    %c0_i32_0 = arith.constant 0 : i32
    return %c0_i32, %arg0 : i32, i32
  }
  func.func @transform_1(%arg0: i32) -> (i32, i32) {
    %c0_i32 = arith.constant 0 : i32
    %c0_i32_0 = arith.constant 0 : i32
    %c0_i32_1 = arith.constant 0 : i32
    return %c0_i32, %c0_i32_0 : i32, i32
  }
  func.func @transform_2(%arg0: i32) -> (i32, i32) {
    %c0_i32 = arith.constant 0 : i32
    %c0_i32_0 = arith.constant 0 : i32
    %c0_i32_1 = arith.constant 0 : i32
    return %c0_i32, %c0_i32_0 : i32, i32
  }
  func.func @transform_3(%arg0: i32) -> (i32, i32) {
    %c0_i32 = arith.constant 0 : i32
    %c0_i32_0 = arith.constant 0 : i32
    %c0_i32_1 = arith.constant 0 : i32
    return %c0_i32, %c0_i32_0 : i32, i32
  }
  func.func @transform_4(%arg0: i32) -> (i32, i32) {
    %c0_i32 = arith.constant 0 : i32
    %c0_i32_0 = arith.constant 0 : i32
    %c0_i32_1 = arith.constant 0 : i32
    return %c0_i32, %c0_i32_0 : i32, i32
  }
  func.func @transform_5(%arg0: i32) -> (i32, i32) {
    %c0_i32 = arith.constant 0 : i32
    %c0_i32_0 = arith.constant 0 : i32
    %c0_i32_1 = arith.constant 0 : i32
    return %c0_i32, %c0_i32_0 : i32, i32
  }
  func.func @transform_6(%arg0: i32) -> (i32, i32) {
    %c0_i32 = arith.constant 0 : i32
    %c0_i32_0 = arith.constant 0 : i32
    %c0_i32_1 = arith.constant 0 : i32
    return %c0_i32, %c0_i32_0 : i32, i32
  }
  func.func @transform_7(%arg0: i32) -> (i32, i32) {
    %c0_i32 = arith.constant 0 : i32
    %c0_i32_0 = arith.constant 0 : i32
    return %c0_i32, %arg0 : i32, i32
  }
}

</mosaic_0001>

<bundles_post_ra>
// kernel: tpu_custom_call.1
= control target key start
LH: loop header
LB: loop body
LE: loop exit
PB: predicated region body
PF: predicated region fallthrough
CT: control target
= control target key end

     0   :  { %12 = vsyncpa [#allocation4], 0  ;;  %s1574_s0 = inlined_call_operand.vmem [shape: f32[10,384], index: 0, kind: input, shape index: {}]   ;;  %s1575_s1 = inlined_call_operand.vmem [shape: f32[128,10], index: 1, kind: input, shape index: {}]   ;;  %s1576_s2 = inlined_call_operand.vmem [shape: f32[128,1], index: 2, kind: input, shape index: {}]   ;;  %s1577_s3 = inlined_call_operand.vmem [shape: f32[64,128], index: 3, kind: input, shape index: {}]   ;;  %s1578_s4 = inlined_call_operand.vmem [shape: f32[64,1], index: 4, kind: input, shape index: {}]   ;;  %s1579_s5 = inlined_call_operand.vmem [shape: f32[2,64], index: 5, kind: input, shape index: {}]   ;;  %s1580_s6 = inlined_call_operand.vmem [shape: f32[2,1], index: 6, kind: input, shape index: {}]   ;;  %s1581_s7 = inlined_call_operand.hbm [shape: f32[2,384], index: 7, kind: output, shape index: {}]  }
   0x1   :  { %14 = vsyncpa [#allocation4 + $0x1], 0  ;;  %s1296_s24 = smov 0   ;;  %s1298_s25 = smov 0  }
   0x2   :  { %s1300_s26 = smov 0   ;;  %s1302_s27 = smov 0  }
   0x3 LB: > { %s973_s28 = sadd.s32 4294967295, %s1250_s27   ;;  %s974_s29 = sadd.s32 4294967294, %s1250_s27   ;;  %s1250_s27 = sphi %s1302_s27, %s1587_s27   ;;  %s1246_s26 = sphi %s1300_s26, %s1586_s26   ;;  %s1242_s25 = sphi %s1298_s25, %s1585_s25   ;;  %s1238_s24 = sphi %s1296_s24, %s1584_s24  }
   0x4   : > { %s1319_s30 = sadd.s32 1, %s1250_s27   ;;  %s27_s8 = sadd.s32 1, %s1246_s26 }
   0x5   : > { %s24_s9 = ssub.s32 %s1250_s27, %s1319_s30  ;;  %p34_p0 = scmp.ne.s32.totalorder %s1246_s26, %s1242_s25 }
   0x6   : > { %p25_p1 = scmp.eq.s32.totalorder %s24_s9, 0  ;;  %p35_p2 = scmp.eq.s32.totalorder %s1250_s27, 0 }
   0x7   : > { %p190_p3 = scmp.eq.s32.totalorder %s973_s28, 2  ;;  %p195_p4 = scmp.ne.s32.totalorder %s1242_s25, %s1238_s24 }
   0x8   : > { %s1332_s10 = scalar_select %p25_p1, %s1246_s26, %s27_s8  }
   0x9   : > { %p36_p5 = por %p35_p2, %p34_p0  ;;  %p1334_p6 = por %p190_p3, %p34_p0 }
   0xa   : > { %p196_p7 = scmp.eq.s32.totalorder %s974_s29, 2  ;;  %p976_p9 = scmp.ge.s32.totalorder %s1250_s27, 3 }
   0xc   : > { %p1338_p8 = por %p196_p7, %p195_p4  ;;  %230 = sbr.rel (%p976_p9) target bundleno = 22 (0x16), region = 40 }
  0x11   : > { %233 = sbr.rel (!%p36_p5) target bundleno = 22 (0x16), region = 44  ;;  %s235_s13 = sand.u32 (%p36_p5), 1, %s1246_s26  }
  0x12   : > { %s978_s14 = sshll.u32 (%p36_p5), %s1250_s27, 3  ;;  %s977_s15 = sshll.u32 (%p36_p5), %s235_s13, 4 }
  0x13   : > { %s239_s18 = scalar_lea.vmem (%p36_p5), %s1574_s0, %s978_s14  ;;  %s237_s19 = scalar_lea.vmem (%p36_p5), [#allocation2], %s977_s15 }
  0x14   : > { %v270_v0 = vld [vmem:[%s239_s18] sm:$0xff] (%p36_p5)  ;;  %v272_v1 = vld [vmem:[%s239_s18 + $0x18] sm:$0xff] (%p36_p5) }
  0x15   : > { %271 = vst [vmem:[%s237_s19] sm:$0xff] (%p36_p5), %v270_v0  ;;  %273 = vst [vmem:[%s237_s19 + $0x8] sm:$0xff] (%p36_p5), %v272_v1 }
  0x16 PF: > { %p979_p10 = scmp.ge.s32.totalorder %s1250_s27, 1  ;;  %p278_p11 = scmp.lt.s32.totalorder %s1250_s27, 4 }
  0x18   : > { %p279_p12 = pnand %p979_p10, %p278_p11 }
  0x19   : > { %s1351_s20 = sand.u32 (!%p279_p12), 1, %s1242_s25   ;;  %s1001_s19 = sshll.u32 (!%p279_p12), %s973_s28, 5 }
  0x1a   : > { %282 = sbr.rel (%p279_p12) target bundleno = 726 (0x2d6), region = 82  ;;  %s980_s23 = sshll.u32 (!%p279_p12), %s1351_s20, 4 }
  0x1b   : > { %s287_s29 = scalar_lea.vmem (!%p279_p12), [#allocation2], %s980_s23  ;;  %s981_s18 = sshll.u32 (!%p279_p12), %s1351_s20, 1 }
  0x1c   : > { %s315_s21 = scalar_lea.vmem (!%p279_p12), [#allocation3], %s981_s18  ;;  %s1538_s8 = scalar_lea.hbm (!%p279_p12), %s1581_s7, %s1001_s19 }
  0x1d   : > { %s909_s22 = sshll.u32 (!%p279_p12), %s315_s21, 4  ;;  %s896_s9 = scalar_lea.sflag (!%p279_p12), [#allocation4], %s1351_s20  ;;  %s910_s22 = int_to_ptr.vmem [resolvable:$true] %s909_s22 }
  0x1e   : > { %s1190_s13 = scalar_lea.vmem (!%p279_p12), %s910_s22, 32  ;;  %s1255_s28 = smov (!%p279_p12), [#allocation3]  }
  0x1f   : > { %v318_v2 = vld [vmem:[%s1575_s1] sm:$0xff]  ;;  %vm430_vm0 = vcmask 80896   ;;  %vm479_vm1 = vcmask 1041408   ;;  %v1252_v3 = vmov 0   ;;  %v317_v4 = vld [vmem:[%s287_s29 + $0x8] sm:$0x3]  ;;  %p1191_p13 = scmp.ne.s32.totalorder %s910_s22, %s1190_s13 }
  0x20   : > { %1059 = vmatprep.mubr.msk.f32.mxu0 %vm430_vm0, %v318_v2  ;;  %1188 = vset.pattern.permute.xlu0 %v1252_v3  ;;  %v316_v5 = vld [vmem:[%s287_s29] sm:$0xff]  ;;  %v319_v6 = vld [vmem:[%s1575_s1 + $0x8] sm:$0xff]  ;;  %v349_v8 = vld [vmem:[%s1576_s2 + $0x78] sm:$0xff]  ;;  %vm1254_vm2 = vmmov 0   ;;  %vm820_vm3 = vcmask 523264   ;;  %s1194_s14 = sshll.u32 %s1255_s28, 4  ;;  %s1195_s14 = int_to_ptr.vmem [resolvable:$false] %s1194_s14 }
  0x21   : > { %1189 = vset.pattern.permute.xlu1 %v1252_v3  ;;  %1055 = vmatprep.subr.msk.mxu0 %vm479_vm1, %v317_v4  ;;  %v320_v7 = vld [vmem:[%s1575_s1 + $0x10] sm:$0xff]  ;;  %v347_v9 = vld [vmem:[%s1576_s2 + $0x68] sm:$0xff]  ;;  %v321_v11 = vld [vmem:[%s1575_s1 + $0x18] sm:$0xff]  ;;  %p1192_p0 = pnand %p1191_p13, %p1334_p6  ;;  %s1196_s15 = scalar_lea.vmem %s1195_s14, 64 }
  0x22   : > { %1056 = vmatpush3.msk.msra.mxu0 %vm479_vm1, %v317_v4  ;;  %427 = vperm.xlu0 %1188, %v349_v8   ;;  %v348_v10 = vld [vmem:[%s1576_s2 + $0x70] sm:$0xff]  ;;  %v346_v12 = vld [vmem:[%s1576_s2 + $0x60] sm:$0xff]  ;;  %v345_v14 = vld [vmem:[%s1576_s2 + $0x58] sm:$0xff]  ;;  %p1197_p2 = scmp.lt.s32.totalorder %s910_s22, %s1195_s14  ;;  %p1198_p3 = scmp.lt.s32.totalorder %s1196_s15, %s1190_s13 }
  0x23   : > { %1057 = vmatprep.subr.mxu0 %v316_v5  ;;  %417 = vperm.xlu1 %1189, %v347_v9   ;;  %v322_v13 = vld [vmem:[%s1575_s1 + $0x20] sm:$0xff]  ;;  %v323_v15 = vld [vmem:[%s1575_s1 + $0x28] sm:$0xff]  ;;  %v344_v16 = vld [vmem:[%s1576_s2 + $0x50] sm:$0xff]  ;;  %p1193_p1 = pneg %p1192_p0 }
  0x24   : > { %1058 = vmatpush3.msra.mxu0 %v316_v5  ;;  %v324_v17 = vld [vmem:[%s1575_s1 + $0x30] sm:$0xff]  ;;  %v343_v18 = vld [vmem:[%s1576_s2 + $0x48] sm:$0xff]  ;;  %v325_v19 = vld [vmem:[%s1575_s1 + $0x38] sm:$0xff]  ;;  %p1199_p4 = por %p1198_p3, %p1197_p2 }
  0x25   : > { %1060 = vmatmul.mubr.msk.f32.vlgmr.msra.gmra.mxu0 %vm430_vm0, %v319_v6  ;;  %v342_v20 = vld [vmem:[%s1576_s2 + $0x40] sm:$0xff]  ;;  %v341_v22 = vld [vmem:[%s1576_s2 + $0x38] sm:$0xff]  ;;  %v327_v23 = vld [vmem:[%s1575_s1 + $0x48] sm:$0xff] }
  0x26   : > { %1062 = vmatprep.mubr.msk.f32.mxu0 %vm430_vm0, %v320_v7  ;;  %422 = vperm.xlu0 %1188, %v348_v10   ;;  %v326_v21 = vld [vmem:[%s1575_s1 + $0x40] sm:$0xff]  ;;  %v340_v24 = vld [vmem:[%s1576_s2 + $0x30] sm:$0xff]  ;;  %v339_v26 = vld [vmem:[%s1576_s2 + $0x28] sm:$0xff]  ;;  %p1200_p5 = pnand %p1199_p4, %p1193_p1 }
  0x27   : > { %412 = vperm.xlu1 %1189, %v346_v12   ;;  %v328_v25 = vld [vmem:[%s1575_s1 + $0x50] sm:$0xff]  ;;  %v329_v27 = vld [vmem:[%s1575_s1 + $0x58] sm:$0xff]  ;;  %v338_v28 = vld [vmem:[%s1576_s2 + $0x20] sm:$0xff] }
  0x28   : > { %v330_v29 = vld [vmem:[%s1575_s1 + $0x60] sm:$0xff]  ;;  %v337_v30 = vld [vmem:[%s1576_s2 + $0x18] sm:$0xff]  ;;  %v331_v31 = vld [vmem:[%s1575_s1 + $0x68] sm:$0xff] }
  0x29   : > { %1063 = vmatmul.mubr.msk.f32.gmra.mxu0 %vm430_vm0, %v321_v11  ;;  %v336_v32 = vld [vmem:[%s1576_s2 + $0x10] sm:$0xff]  ;;  %v335_v34 = vld [vmem:[%s1576_s2 + $0x8] sm:$0xff]  ;;  %v333_v35 = vld [vmem:[%s1575_s1 + $0x78] sm:$0xff] }
  0x2a   : > { %1065 = vmatprep.mubr.msk.f32.mxu0 %vm430_vm0, %v322_v13  ;;  %407 = vperm.xlu0 %1188, %v345_v14   ;;  %v332_v33 = vld [vmem:[%s1575_s1 + $0x70] sm:$0xff]  ;;  %v334_v36 = vld [vmem:[%s1576_s2] sm:$0xff]  ;;  %v659_v37 = vld [vmem:[%s1578_s4 + $0x38] sm:$0xff] }
  0x2b   : > { %402 = vperm.xlu1 %1189, %v344_v16   ;;  %v658_v38 = vld [vmem:[%s1578_s4 + $0x30] sm:$0xff]  ;;  %v657_v39 = vld [vmem:[%s1578_s4 + $0x28] sm:$0xff]  ;;  %v656_v40 = vld [vmem:[%s1578_s4 + $0x20] sm:$0xff] }
  0x2c   : > { %v655_v41 = vld [vmem:[%s1578_s4 + $0x18] sm:$0xff]  ;;  %v654_v42 = vld [vmem:[%s1578_s4 + $0x10] sm:$0xff]  ;;  %v653_v43 = vld [vmem:[%s1578_s4 + $0x8] sm:$0xff] }
  0x2d   : > { %1066 = vmatmul.mubr.msk.f32.gmra.mxu0 %vm430_vm0, %v323_v15  ;;  %v652_v44 = vld [vmem:[%s1578_s4] sm:$0xff] }
  0x2e   : > { %1068 = vmatprep.mubr.msk.f32.mxu0 %vm430_vm0, %v324_v17  ;;  %397 = vperm.xlu0 %1188, %v343_v18   ;;  %v814_v45 = vld [vmem:[%s1580_s6] sm:$0x3] }
  0x2f   : > { %392 = vperm.xlu1 %1189, %v342_v20   ;;  %v644_v46 = vld [vmem:[%s1577_s3] sm:$0xff] }
  0x30   : > { %1115 = vmatprep.mubr.f32.mxu1 %v644_v46 }
  0x31   : > { %1069 = vmatmul.mubr.msk.f32.gmra.mxu0 %vm430_vm0, %v325_v19 }
  0x32   : > { %1071 = vmatprep.mubr.msk.f32.mxu0 %vm430_vm0, %v326_v21  ;;  %387 = vperm.xlu0 %1188, %v341_v22  }
  0x33   : > { %382 = vperm.xlu1 %1189, %v340_v24  }
  0x35   : > { %1072 = vmatmul.mubr.msk.f32.gmra.mxu0 %vm430_vm0, %v327_v23 }
  0x36   : > { %1074 = vmatprep.mubr.msk.f32.mxu0 %vm430_vm0, %v328_v25  ;;  %377 = vperm.xlu0 %1188, %v339_v26  }
  0x37   : > { %372 = vperm.xlu1 %1189, %v338_v28  }
  0x39   : > { %1075 = vmatmul.mubr.msk.f32.gmra.mxu0 %vm430_vm0, %v329_v27 }
  0x3a   : > { %1077 = vmatprep.mubr.msk.f32.mxu0 %vm430_vm0, %v330_v29  ;;  %367 = vperm.xlu0 %1188, %v337_v30  }
  0x3b   : > { %362 = vperm.xlu1 %1189, %v336_v32  }
  0x3d   : > { %1078 = vmatmul.mubr.msk.f32.gmra.mxu0 %vm430_vm0, %v331_v31 }
  0x3e   : > { %1080 = vmatprep.mubr.msk.f32.mxu0 %vm430_vm0, %v332_v33  ;;  %357 = vperm.xlu0 %1188, %v335_v34  }
  0x3f   : > { %352 = vperm.xlu1 %1189, %v334_v36  }
  0x41   : > { %1081 = vmatmul.mubr.msk.f32.gmra.mxu0 %vm430_vm0, %v333_v35 }
  0x42   : > { %697 = vperm.xlu0 %1188, %v659_v37  }
  0x43   : > { %692 = vperm.xlu1 %1189, %v658_v38  }
  0x46   : > { %687 = vperm.xlu0 %1188, %v657_v39  }
  0x47   : > { %682 = vperm.xlu1 %1189, %v656_v40  }
  0x4a   : > { %677 = vperm.xlu0 %1188, %v655_v41  }
  0x4b   : > { %672 = vperm.xlu1 %1189, %v654_v42  }
  0x4e   : > { %667 = vperm.xlu0 %1188, %v653_v43  }
  0x4f   : > { %662 = vperm.xlu1 %1189, %v652_v44  }
  0x52   : > { %817 = vperm.xlu0 %1188, %v814_v45  }
  0x9d   : > { %v428_v52 = vpop.permute.xlu0 %427 }
  0x9e   : > { %v418_v54 = vpop.permute.xlu1 %417 }
  0xa1   : > { %v423_v57 = vpop.permute.xlu0 %422 }
  0xa2   : > { %v413_v59 = vpop.permute.xlu1 %412 }
  0xa5   : > { %v408_v62 = vpop.permute.xlu0 %407 }
  0xa6   : > { %v403_v0 = vpop.permute.xlu1 %402 }
  0xa9   : > { %v398_v3 = vpop.permute.xlu0 %397 }
  0xaa   : > { %v393_v6 = vpop.permute.xlu1 %392 }
  0xad   : > { %v388_v13 = vpop.permute.xlu0 %387 }
  0xae   : > { %v383_v16 = vpop.permute.xlu1 %382 }
  0xb1   : > { %v378_v21 = vpop.permute.xlu0 %377 }
  0xb2   : > { %v373_v24 = vpop.permute.xlu1 %372 }
  0xb5   : > { %v368_v29 = vpop.permute.xlu0 %367 }
  0xb6   : > { %v363_v32 = vpop.permute.xlu1 %362 }
  0xb9   : > { %v358_v37 = vpop.permute.xlu0 %357 }
  0xba   : > { %v353_v40 = vpop.permute.xlu1 %352 }
  0xe5   : > { %v1496_v47 = vpop.f32.mrf.mxu0 }
  0xe6   : > { %v555_v41 = vadd.f32 %v1496_v47, %v358_v37  ;;  %v646_v47 = vld [vmem:[%s1577_s3 + $0x10] sm:$0xff] }
  0xe7   : > { %v1498_v48 = vpop.f32.mrf.mxu0 }
  0xe8   : > { %v550_v43 = vadd.f32 %v1498_v48, %v353_v40  ;;  %v629_v45 = vmax.f32 %v555_v41, 0.0  ;;  %v647_v48 = vld [vmem:[%s1577_s3 + $0x18] sm:$0xff] }
  0xe9   : > { %v1500_v49 = vpop.f32.mrf.mxu0 }
  0xea   : > { %v565_v35 = vadd.f32 %v1500_v49, %v368_v29  ;;  %v628_v46 = vmax.f32 %v550_v43, 0.0  ;;  %v645_v49 = vld [vmem:[%s1577_s3 + $0x8] sm:$0xff] }
  0xeb   : > { %v1502_v50 = vpop.f32.mrf.mxu0 }
  0xec   : > { %v560_v38 = vadd.f32 %v1502_v50, %v363_v32  ;;  %v631_v42 = vmax.f32 %v565_v35, 0.0  ;;  %v648_v50 = vld [vmem:[%s1577_s3 + $0x20] sm:$0xff] }
  0xed   : > { %v1067_v51 = vpop.f32.mrf.mxu0 }
  0xee   : > { %v575_v30 = vadd.f32 %v1067_v51, %v378_v21  ;;  %v630_v44 = vmax.f32 %v560_v38, 0.0  ;;  %v649_v51 = vld [vmem:[%s1577_s3 + $0x28] sm:$0xff] }
  0xef   : > { %v569_v53 = vpop.f32.mrf.mxu0 }
  0xf0   : > { %v570_v33 = vadd.f32 %v569_v53, %v373_v24  ;;  %v633_v36 = vmax.f32 %v575_v30, 0.0  ;;  %v651_v53 = vld [vmem:[%s1577_s3 + $0x38] sm:$0xff] }
  0xf1   : > { %v1070_v55 = vpop.f32.mrf.mxu0 }
  0xf2   : > { %v585_v25 = vadd.f32 %v1070_v55, %v388_v13  ;;  %v632_v39 = vmax.f32 %v570_v33, 0.0 }
  0xf3   : > { %v579_v56 = vpop.f32.mrf.mxu0 }
  0xf4   : > { %v580_v27 = vadd.f32 %v579_v56, %v383_v16  ;;  %v635_v31 = vmax.f32 %v585_v25, 0.0 }
  0xf5   : > { %v1073_v58 = vpop.f32.mrf.mxu0 }
  0xf6   : > { %v595_v19 = vadd.f32 %v1073_v58, %v398_v3  ;;  %v634_v34 = vmax.f32 %v580_v27, 0.0 }
  0xf7   : > { %v589_v60 = vpop.f32.mrf.mxu0 }
  0xf8   : > { %v590_v22 = vadd.f32 %v589_v60, %v393_v6  ;;  %v637_v26 = vmax.f32 %v595_v19, 0.0 }
  0xf9   : > { %v1076_v61 = vpop.f32.mrf.mxu0 }
  0xfa   : > { %v605_v14 = vadd.f32 %v1076_v61, %v408_v62  ;;  %v636_v28 = vmax.f32 %v590_v22, 0.0 }
  0xfb   : > { %v599_v63 = vpop.f32.mrf.mxu0 }
  0xfc   : > { %v600_v17 = vadd.f32 %v599_v63, %v403_v0  ;;  %v639_v20 = vmax.f32 %v605_v14, 0.0 }
  0xfd   : > { %v1079_v1 = vpop.f32.mrf.mxu0 }
  0xfe   : > { %v615_v8 = vadd.f32 %v1079_v1, %v418_v54  ;;  %v638_v23 = vmax.f32 %v600_v17, 0.0  ;;  %v1253_v54 = vmov 0.0  }
  0xff   : > { %v609_v2 = vpop.f32.mrf.mxu0  ;;  %1127 = vmatprep.subr.mxu0 %v1253_v54  ;;  %1143 = vmatprep.mubr.msk.f32.mxu0 %vm1254_vm2, %v1253_v54 }
 0x100   : > { %v610_v11 = vadd.f32 %v609_v2, %v413_v59  ;;  %v641_v15 = vmax.f32 %v615_v8, 0.0  ;;  %v693_v59 = vpop.permute.xlu1 %692 }
 0x101   : > { %v1082_v4 = vpop.f32.mrf.mxu0 }
 0x102   : > { %v625_v5 = vadd.f32 %v1082_v4, %v428_v52  ;;  %v640_v18 = vmax.f32 %v610_v11, 0.0  ;;  %v650_v52 = vld [vmem:[%s1577_s3 + $0x30] sm:$0xff] }
 0x103   : > { %v619_v7 = vpop.f32.mrf.mxu0 }
 0x104   : > { %v643_v9 = vmax.f32 %v625_v5, 0.0  ;;  %v620_v10 = vadd.f32 %v619_v7, %v423_v57  ;;  %v698_v57 = vpop.permute.xlu0 %697  ;;  %v683_v0 = vpop.permute.xlu1 %682 }
 0x106   : > { %v642_v12 = vmax.f32 %v620_v10, 0.0  ;;  %1083 = vmatprep.subr.mxu1 %v643_v9 }
 0x107   : > { %1084 = vmatpush3.msra.mxu1 %v643_v9 }
 0x108   : > { %1085 = vmatprep.subr.mxu1 %v642_v12  ;;  %v688_v62 = vpop.permute.xlu0 %687  ;;  %v673_v10 = vpop.permute.xlu1 %672 }
 0x109   : > { %1086 = vmatpush3.msra.mxu1 %v642_v12 }
 0x10a   : > { %1087 = vmatprep.subr.mxu1 %v641_v15 }
 0x10b   : > { %1088 = vmatpush3.msra.mxu1 %v641_v15 }
 0x10c   : > { %1089 = vmatprep.subr.mxu1 %v640_v18  ;;  %v678_v7 = vpop.permute.xlu0 %677 }
 0x10d   : > { %1090 = vmatpush3.msra.mxu1 %v640_v18  ;;  %v663_v18 = vpop.permute.xlu1 %662 }
 0x10e   : > { %1091 = vmatprep.subr.mxu1 %v639_v20 }
 0x10f   : > { %1092 = vmatpush3.msra.mxu1 %v639_v20 }
 0x110   : > { %1093 = vmatprep.subr.mxu1 %v638_v23  ;;  %v668_v15 = vpop.permute.xlu0 %667 }
 0x111   : > { %1094 = vmatpush3.msra.mxu1 %v638_v23  ;;  %v813_v23 = vld [vmem:[%s1579_s5] sm:$0x3] }
 0x112   : > { %1095 = vmatprep.subr.mxu1 %v637_v26 }
 0x113   : > { %1096 = vmatpush3.msra.mxu1 %v637_v26 }
 0x114   : > { %1097 = vmatprep.subr.mxu1 %v636_v28  ;;  %v818_v24 = vpop.permute.xlu0 %817 }
 0x115   : > { %1098 = vmatpush3.msra.mxu1 %v636_v28 }
 0x116   : > { %1099 = vmatprep.subr.mxu1 %v635_v31 }
 0x117   : > { %1100 = vmatpush3.msra.mxu1 %v635_v31 }
 0x118   : > { %1101 = vmatprep.subr.mxu1 %v634_v34 }
 0x119   : > { %1102 = vmatpush3.msra.mxu1 %v634_v34 }
 0x11a   : > { %1103 = vmatprep.subr.mxu1 %v633_v36 }
 0x11b   : > { %1104 = vmatpush3.msra.mxu1 %v633_v36 }
 0x11c   : > { %1105 = vmatprep.subr.mxu1 %v632_v39 }
 0x11d   : > { %1106 = vmatpush3.msra.mxu1 %v632_v39 }
 0x11e   : > { %1107 = vmatprep.subr.mxu1 %v631_v42 }
 0x11f   : > { %1108 = vmatpush3.msra.mxu1 %v631_v42 }
 0x120   : > { %1109 = vmatprep.subr.mxu1 %v630_v44 }
 0x121   : > { %1110 = vmatpush3.msra.mxu1 %v630_v44 }
 0x122   : > { %1111 = vmatprep.subr.mxu1 %v629_v45 }
 0x123   : > { %1112 = vmatpush3.msra.mxu1 %v629_v45 }
 0x124   : > { %1113 = vmatprep.subr.mxu1 %v628_v46 }
 0x125   : > { %1114 = vmatpush3.msra.mxu1 %v628_v46 }
 0x126   : > { %1116 = vmatmul.mubr.f32.vlgmr.msra.gmra.mxu1 %v645_v49 }
 0x127   : > { %1118 = vmatprep.mubr.f32.mxu1 %v646_v47 }
 0x12a   : > { %1119 = vmatmul.mubr.f32.gmra.mxu1 %v647_v48 }
 0x12b   : > { %1121 = vmatprep.mubr.f32.mxu1 %v648_v50 }
 0x12e   : > { %1122 = vmatmul.mubr.f32.gmra.mxu1 %v649_v51 }
 0x12f   : > { %1124 = vmatprep.mubr.f32.mxu1 %v650_v52 }
 0x132   : > { %1125 = vmatmul.mubr.f32.gmra.mxu1 %v651_v53 }
 0x1e6   : > { %v1117_v55 = vpop.f32.mrf.mxu1 }
 0x1e7   : > { %v772_v16 = vadd.f32 %v1117_v55, %v668_v15 }
 0x1e8   : > { %v766_v56 = vpop.f32.mrf.mxu1 }
 0x1e9   : > { %v767_v19 = vadd.f32 %v766_v56, %v663_v18  ;;  %v806_v21 = vmax.f32 %v772_v16, 0.0 }
 0x1ea   : > { %v1120_v58 = vpop.f32.mrf.mxu1 }
 0x1eb   : > { %v782_v11 = vadd.f32 %v1120_v58, %v678_v7  ;;  %v805_v22 = vmax.f32 %v767_v19, 0.0 }
 0x1ec   : > { %v776_v60 = vpop.f32.mrf.mxu1 }
 0x1ed   : > { %v777_v13 = vadd.f32 %v776_v60, %v673_v10  ;;  %v808_v17 = vmax.f32 %v782_v11, 0.0 }
 0x1ee   : > { %v1123_v61 = vpop.f32.mrf.mxu1 }
 0x1ef   : > { %v792_v4 = vadd.f32 %v1123_v61, %v688_v62  ;;  %v807_v20 = vmax.f32 %v777_v13, 0.0 }
 0x1f0   : > { %v786_v63 = vpop.f32.mrf.mxu1 }
 0x1f1   : > { %v787_v8 = vadd.f32 %v786_v63, %v683_v0  ;;  %v810_v12 = vmax.f32 %v792_v4, 0.0 }
 0x1f2   : > { %v1126_v1 = vpop.f32.mrf.mxu1 }
 0x1f3   : > { %v802_v2 = vadd.f32 %v1126_v1, %v698_v57  ;;  %v809_v14 = vmax.f32 %v787_v8, 0.0 }
 0x1f4   : > { %v796_v3 = vpop.f32.mrf.mxu1 }
 0x1f5   : > { %v812_v5 = vmax.f32 %v802_v2, 0.0  ;;  %v797_v6 = vadd.f32 %v796_v3, %v693_v59 }
 0x1f7   : > { %v811_v9 = vmax.f32 %v797_v6, 0.0  ;;  %1128 = vmatpush3.msra.mxu0 %v812_v5 }
 0x1f8   : > { %1129 = vmatprep.subr.mxu0 %v1253_v54 }
 0x1f9   : > { %1130 = vmatpush3.msra.mxu0 %v811_v9 }
 0x1fa   : > { %1131 = vmatprep.subr.mxu0 %v1253_v54 }
 0x1fb   : > { %1132 = vmatpush3.msra.mxu0 %v810_v12 }
 0x1fc   : > { %1133 = vmatprep.subr.mxu0 %v1253_v54 }
 0x1fd   : > { %1134 = vmatpush3.msra.mxu0 %v809_v14 }
 0x1fe   : > { %1135 = vmatprep.subr.mxu0 %v1253_v54 }
 0x1ff   : > { %1136 = vmatpush3.msra.mxu0 %v808_v17 }
 0x200   : > { %1137 = vmatprep.subr.mxu0 %v1253_v54 }
 0x201   : > { %1138 = vmatpush3.msra.mxu0 %v807_v20 }
 0x202   : > { %1139 = vmatprep.subr.mxu0 %v1253_v54 }
 0x203   : > { %1140 = vmatpush3.msra.mxu0 %v806_v21 }
 0x204   : > { %1141 = vmatprep.subr.mxu0 %v1253_v54 }
 0x205   : > { %1142 = vmatpush3.msra.mxu0 %v805_v22 }
 0x206   : > { %1144 = vmatmul.mubr.msk.f32.vlgmr.msra.gmra.mxu0 %vm820_vm3, %v813_v23 }
 0x2c6   : > { %v890_v25 = vpop.f32.mrf.mxu0 }
 0x2c7   : > { %v891_v26 = vadd.f32 %v890_v25, %v818_v24 }
 0x2c8   : > { %v1145_v27 = vpop.f32.mrf.mxu0 }
 0x2c9   : > { %894 = vst [vmem:[%s315_s21] sm:$0x3] %v891_v26 }
 0x2ca   : > { %1203 = shalt.err (!%p1200_p5)
}
 0x2cb   : > { %s1204_s16 = scalar_lea.hbm %s1538_s8, 32  ;;  %s1208_s18 = scalar_lea.hbm %s1581_s7, 96 }
 0x2cc   : > { %p1205_p7 = scmp.ne.s32.totalorder %s1538_s8, %s1204_s16  ;;  %p1209_p11 = scmp.lt.s32.totalorder %s1538_s8, %s1581_s7 }
 0x2cd   : > { %p1210_p12 = scmp.lt.s32.totalorder %s1208_s18, %s1204_s16 }
 0x2ce   : > { %p1206_p9 = pnand %p1205_p7, %p1334_p6 }
 0x2cf   : > { %p1211_p13 = por %p1210_p12, %p1209_p11 }
 0x2d0   : > { %p1207_p10 = pneg %p1206_p9 }
 0x2d2   : > { %p1212_p0 = pnand %p1211_p13, %p1207_p10 }
 0x2d4   : > { %1215 = shalt.err (!%p1212_p0)
}
 0x2d5   : > { %1146 = dma.vmem_to_hbm [thread:$0]  (%p1334_p6), %s910_s22, 32, %s1538_s8, %s896_s9  }
 0x2d6 PF: > { %p1152_p1 = scmp.ge.s32.totalorder %s1250_s27, 2  ;;  %s921_s23 = sand.u32 1, %s1238_s24  }
 0x2d7   : > { %s922_s29 = scalar_lea.sflag [#allocation4], %s921_s23 }
 0x2d8   : > { %p1149_p2 = pnand %p1152_p1, %p1338_p8 }
 0x2da   : > { %p1150_p3 = pneg %p1149_p2 }
 0x2dc   : > { %1233 = dma.done.wait (%p1150_p3), %s922_s29, 32  }
 0x2dd   : > { %1235 = vsyncadd (%p1150_p3), %s922_s29, 4294967264  ;;  %p17_p4 = scmp.ge.s32.totalorder %s1319_s30, 5   ;;  %s1584_s24 = smov %s1242_s25 }
 0x2de   : > { %s1585_s25 = smov %s1246_s26  ;;  %s1586_s26 = smov %s1332_s10 }
 0x2df   : > { %s1587_s27 = smov %s1319_s30  ;;  %19 = sbr.rel (!%p17_p4) target bundleno = 3 (0x3), region = 126 }
 0x2e4   :  { %927 = vsyncpa [#allocation4], 1 }
 0x2e5   :  { %929 = vsyncpa [#allocation4 + $0x1], 1 }

</bundles_post_ra>
